<compile_context>
chip_gen: v6e
topology: v6e:2x2x1
jax: 0.10.0
libtpu: 0.0.40
codegen_flags: <defaults>
</compile_context>

<pallas_src>
import jax
import jax.numpy as jnp
from jax import lax
from jax.experimental import pallas as pl
from jax.experimental.pallas import tpu as pltpu


def _linear_kernel(x_ref, w_ref, b_ref, o_ref):
    # x_ref: (TB, D)   w_ref: (C_pad, D)   b_ref: (1, C_pad)   o_ref: (TB, C_pad)
    acc = lax.dot_general(
        x_ref[...], w_ref[...],
        dimension_numbers=(((1,), (1,)), ((), ())),   # contract D against D
        preferred_element_type=jnp.float32,
    )
    o_ref[...] = (acc + b_ref[...]).astype(o_ref.dtype)


def pad_classifier_params(weight, bias, lane=128):
    """One-time setup: pad class dim to a multiple of 128 (lane-dense output).

    weight: [C, D] (PyTorch nn.Linear layout), bias: [C]
    Returns (w_pad [C_pad, D], b_pad [1, C_pad]).
    """
    C, D = weight.shape
    C_pad = ((C + lane - 1) // lane) * lane
    w_pad = jnp.zeros((C_pad, D), weight.dtype).at[:C, :].set(weight)
    b_pad = jnp.zeros((1, C_pad), bias.dtype).at[0, :C].set(bias)
    return w_pad, b_pad


def feat_classifier_forward(x, w_pad, b_pad, class_num, block_batch=2048):
    """x: [B, D] float32; w_pad: [C_pad, D]; b_pad: [1, C_pad] (from pad_classifier_params)."""
    B, D = x.shape
    C_pad = w_pad.shape[0]

    # Tile the batch dim.  TB must be a multiple of 8 (sublane rule) or equal
    # to the full batch extent.
    TB = min(block_batch, B)
    if TB % 8 != 0:
        TB = B  # full-extent block always satisfies the layout constraint
    grid = (pl.cdiv(B, TB),)

    itemsize = jnp.dtype(x.dtype).itemsize
    cost = pl.CostEstimate(
        flops=2 * B * D * C_pad,
        transcendentals=0,
        bytes_accessed=B * D * itemsize + C_pad * D * 4 + C_pad * 4 + B * C_pad * itemsize,
    )

    out_pad = pl.pallas_call(
        _linear_kernel,
        out_shape=jax.ShapeDtypeStruct((B, C_pad), x.dtype),
        grid=grid,
        in_specs=[
            pl.BlockSpec((TB, D), lambda i: (i, 0)),       # streamed x tiles
            pl.BlockSpec((C_pad, D), lambda i: (0, 0)),    # weight, grid-invariant
            pl.BlockSpec((1, C_pad), lambda i: (0, 0)),    # bias row, grid-invariant
        ],
        out_specs=pl.BlockSpec((TB, C_pad), lambda i: (i, 0)),
        compiler_params=pltpu.CompilerParams(
            dimension_semantics=("parallel",),             # batch tiles are independent
        ),
        cost_estimate=cost,
    )(x, w_pad, b_pad)

    return out_pad[:, :class_num]   # drop zero-padded logit columns


def init_feat_classifier_params(key, class_num, bottleneck_dim=256):
    """Deterministic init matching init_weights: Xavier-normal weight, zero bias."""
    # xavier_normal_: std = sqrt(2 / (fan_in + fan_out))
    std = (2.0 / (bottleneck_dim + class_num)) ** 0.5
    weight = std * jax.random.normal(
        key, (class_num, bottleneck_dim), dtype=jnp.float32
    )
    bias = jnp.zeros((class_num,), dtype=jnp.float32)
    return weight, bias


if __name__ == "__main__":
    class_num = 10
    bottleneck_dim = 256   # module default

    key = jax.random.PRNGKey(0)
    k_w, k_x1, k_x2 = jax.random.split(key, 3)

    weight, bias = init_feat_classifier_params(k_w, class_num, bottleneck_dim)
    w_pad, b_pad = pad_classifier_params(weight, bias)   # one-time setup (outside per-call path)

    # Small inference-sized batch (single tile).
    x_small = jax.random.normal(k_x1, (8, bottleneck_dim), dtype=jnp.float32)
    out_small = jax.block_until_ready(
        feat_classifier_forward(x_small, w_pad, b_pad, class_num)
    )
    ref_small = x_small @ weight.T + bias
    assert out_small.shape == (8, class_num)
    assert jnp.allclose(out_small, ref_small, atol=1e-5, rtol=1e-5)

    # Slightly larger batch with a small block to exercise the multi-tile,
    # pipelined ("parallel" grid) path.
    x_big = jax.random.normal(k_x2, (256, bottleneck_dim), dtype=jnp.float32)
    out_big = jax.block_until_ready(
        feat_classifier_forward(x_big, w_pad, b_pad, class_num, block_batch=64)
    )
    ref_big = x_big @ weight.T + bias
    assert out_big.shape == (256, class_num)
    assert jnp.allclose(out_big, ref_big, atol=1e-5, rtol=1e-5)

    print("KERNEL_OK")
</pallas_src>

<mosaic_0001>
module attributes {stable_mosaic.version = 11 : i64} {
  func.func @_linear_kernel(%arg0: i32, %arg1: memref<8x256xf32, #tpu.memory_space<vmem>>, %arg2: memref<128x256xf32, #tpu.memory_space<vmem>>, %arg3: memref<1x128xf32, #tpu.memory_space<vmem>>, %arg4: memref<8x128xf32, #tpu.memory_space<vmem>>) attributes {dimension_semantics = [#tpu.dimension_semantics<parallel>], iteration_bounds = array<i64: 1>, scalar_prefetch = 0 : i64, scratch_operands = 0 : i64, tpu.core_type = #tpu.core_type<tc>, window_params = [{transform_indices = @transform_0, window_bounds = array<i64: 8, 256>}, {pipeline_mode = #tpu.pipeline_mode<synchronous>, transform_indices = @transform_1, window_bounds = array<i64: 128, 256>}, {pipeline_mode = #tpu.pipeline_mode<synchronous>, transform_indices = @transform_2, window_bounds = array<i64: 1, 128>}, {transform_indices = @transform_3, window_bounds = array<i64: 8, 128>}]} {
    %c0 = arith.constant 0 : index
    %c0_0 = arith.constant 0 : index
    %0 = vector.load %arg1[%c0, %c0_0] : memref<8x256xf32, #tpu.memory_space<vmem>>, vector<8x256xf32>
    %c0_1 = arith.constant 0 : index
    %c0_2 = arith.constant 0 : index
    %1 = vector.load %arg2[%c0_1, %c0_2] : memref<128x256xf32, #tpu.memory_space<vmem>>, vector<128x256xf32>
    %cst = arith.constant dense<0.000000e+00> : vector<8x128xf32>
    %2 = tpu.matmul %0, %1, %cst {dimension_numbers = #tpu.dot_dimension_numbers<[1], [1], [0], [0], [0, 0, 1, 0], [], []>} : vector<8x256xf32>, vector<128x256xf32>, vector<8x128xf32> -> vector<8x128xf32>
    %c0_3 = arith.constant 0 : index
    %c0_4 = arith.constant 0 : index
    %3 = vector.load %arg3[%c0_3, %c0_4] : memref<1x128xf32, #tpu.memory_space<vmem>>, vector<1x128xf32>
    %4 = vector.broadcast %3 : vector<1x128xf32> to vector<8x128xf32>
    %5 = arith.addf %2, %4 : vector<8x128xf32>
    %c0_5 = arith.constant 0 : index
    %c0_6 = arith.constant 0 : index
    %6 = vector.load %arg4[%c0_5, %c0_6] : memref<8x128xf32, #tpu.memory_space<vmem>>, vector<8x128xf32>
    tpu.vector_store %arg4[%c0_5, %c0_6], %5 {strides = array<i32>} : memref<8x128xf32, #tpu.memory_space<vmem>>, vector<8x128xf32>,
    return
  }
  func.func @transform_0(%arg0: i32) -> (i32, i32) {
    %c0_i32 = arith.constant 0 : i32
    %c0_i32_0 = arith.constant 0 : i32
    return %arg0, %c0_i32 : i32, i32
  }
  func.func @transform_1(%arg0: i32) -> (i32, i32) {
    %c0_i32 = arith.constant 0 : i32
    %c0_i32_0 = arith.constant 0 : i32
    %c0_i32_1 = arith.constant 0 : i32
    return %c0_i32, %c0_i32_0 : i32, i32
  }
  func.func @transform_2(%arg0: i32) -> (i32, i32) {
    %c0_i32 = arith.constant 0 : i32
    %c0_i32_0 = arith.constant 0 : i32
    %c0_i32_1 = arith.constant 0 : i32
    return %c0_i32, %c0_i32_0 : i32, i32
  }
  func.func @transform_3(%arg0: i32) -> (i32, i32) {
    %c0_i32 = arith.constant 0 : i32
    %c0_i32_0 = arith.constant 0 : i32
    return %arg0, %c0_i32 : i32, i32
  }
}

</mosaic_0001>

<bundles_post_ra>
// kernel: tpu_custom_call.1
= control target key start
LH: loop header
LB: loop body
LE: loop exit
PB: predicated region body
PF: predicated region fallthrough
CT: control target
= control target key end

     0   :  { %8 = vsyncpa [#allocation3], 0  ;;  %s278_s0 = inlined_call_operand.hbm [shape: f32[8,256], index: 0, kind: input, shape index: {}]   ;;  %s279_s1 = inlined_call_operand.hbm [shape: f32[128,256], index: 1, kind: input, shape index: {}]   ;;  %s280_s2 = inlined_call_operand.vmem [shape: f32[1,128], index: 2, kind: input, shape index: {}]   ;;  %s281_s3 = inlined_call_operand.hbm [shape: f32[8,128], index: 3, kind: output, shape index: {}]  }
   0x1   :  { %9 = vsyncpa [#allocation6], 0 }
   0x2   :  { %10 = vsyncpa [#allocation4], 0  ;;  %s241_s12 = smov [#allocation2]   ;;  %s242_s14 = smov [#allocation5]  }
   0x3   :  { %s17_s13 = sshll.u32 %s241_s12, 4  ;;  %s26_s15 = sshll.u32 %s242_s14, 4  ;;  %s18_s13 = int_to_ptr.vmem [resolvable:$true] %s17_s13  ;;  %s27_s15 = int_to_ptr.vmem [resolvable:$true] %s26_s15 }
   0x4   :  { %s183_s16 = scalar_lea.vmem %s18_s13, 256  ;;  %p188_p1 = scmp.lt.s32.totalorder %s18_s13, %s18_s13 }
   0x5   :  { %p184_p0 = scmp.ne.s32.totalorder %s18_s13, %s183_s16  ;;  %p189_p2 = scmp.lt.s32.totalorder %s183_s16, %s183_s16 }
   0x7   :  { %p190_p3 = por %p189_p2, %p188_p1 }
   0x9   :  { %p191_p4 = pnand %p190_p3, %p184_p0 }
   0xb   :  { %194 = shalt.err (!%p191_p4)
}
   0xc   :  { %20 = dma.hbm_to_vmem [thread:$0]  %s278_s0, 256, %s18_s13, [#allocation3]  }
   0xd   :  { %s203_s19 = scalar_lea.vmem %s27_s15, 4096  ;;  %p208_p6 = scmp.lt.s32.totalorder %s27_s15, %s27_s15 }
   0xe   :  { %p204_p5 = scmp.ne.s32.totalorder %s27_s15, %s203_s19  ;;  %p209_p7 = scmp.lt.s32.totalorder %s203_s19, %s203_s19 }
  0x10   :  { %p210_p8 = por %p209_p7, %p208_p6 }
  0x12   :  { %p211_p9 = pnand %p210_p8, %p204_p5 }
  0x14   :  { %214 = shalt.err (!%p211_p9)
}
  0x15   :  { %s243_s20 = smov 256   ;;  %s244_s21 = smov 16  }
  0x16   :  { %32 = dma.hbm_to_vmem [thread:$0]  %s279_s1, 4096, %s27_s15, [#allocation6], %s243_s20, %s243_s20, %s244_s21  }
  0x17   :  { %235 = dma.done.wait [#allocation3], 256  }
  0x18   :  { %236 = vsyncadd [#allocation3], 4294967040 }
  0x19   :  { %237 = dma.done.wait [#allocation6], 4096  }
  0x1a   :  { %238 = vsyncadd [#allocation6], 4294963200  ;;  %v74_v0 = vld [vmem:[#allocation5 + $0xf8] sm:$0xff]  ;;  %v73_v1 = vld [vmem:[#allocation5 + $0xf0] sm:$0xff]  ;;  %s245_s24 = smov [#allocation7]  }
  0x1b   :  { %v72_v2 = vld [vmem:[#allocation5 + $0xe8] sm:$0xff]  ;;  %82 = vmatprep.subr.mxu0 %v74_v0  ;;  %v71_v3 = vld [vmem:[#allocation5 + $0xe0] sm:$0xff]  ;;  %v70_v4 = vld [vmem:[#allocation5 + $0xd8] sm:$0xff]  ;;  %s159_s25 = sshll.u32 %s245_s24, 4  ;;  %s160_s25 = int_to_ptr.vmem [resolvable:$true] %s159_s25 }
  0x1c   :  { %83 = vmatpush1.xpose.msra.mxu0 %v73_v1  ;;  %v69_v5 = vld [vmem:[#allocation5 + $0xd0] sm:$0xff]  ;;  %v68_v6 = vld [vmem:[#allocation5 + $0xc8] sm:$0xff]  ;;  %v42_v7 = vld [vmem:[#allocation2 + $0x8] sm:$0xff]  ;;  %s215_s26 = scalar_lea.vmem %s160_s25, 128  ;;  %p220_p11 = scmp.lt.s32.totalorder %s160_s25, %s160_s25 }
  0x1d   :  { %84 = vmatprep.subr.mxu0 %v72_v2  ;;  %v67_v8 = vld [vmem:[#allocation5 + $0xc0] sm:$0xff]  ;;  %146 = vmatprep.mubr.f32.mxu0 %v42_v7  ;;  %v66_v9 = vld [vmem:[#allocation5 + $0xb8] sm:$0xff]  ;;  %v65_v10 = vld [vmem:[#allocation5 + $0xb0] sm:$0xff]  ;;  %p216_p10 = scmp.ne.s32.totalorder %s160_s25, %s215_s26  ;;  %p221_p12 = scmp.lt.s32.totalorder %s215_s26, %s215_s26 }
  0x1e   :  { %v64_v11 = vld [vmem:[#allocation5 + $0xa8] sm:$0xff]  ;;  %v63_v12 = vld [vmem:[#allocation5 + $0xa0] sm:$0xff]  ;;  %v62_v13 = vld [vmem:[#allocation5 + $0x98] sm:$0xff] }
  0x1f   :  { %v61_v14 = vld [vmem:[#allocation5 + $0x90] sm:$0xff]  ;;  %v60_v15 = vld [vmem:[#allocation5 + $0x88] sm:$0xff]  ;;  %v59_v16 = vld [vmem:[#allocation5 + $0x80] sm:$0xff]  ;;  %p222_p13 = por %p221_p12, %p220_p11 }
  0x20   :  { %85 = vmatpush1.xpose.msra.mxu0 %v71_v3  ;;  %v58_v17 = vld [vmem:[#allocation5 + $0x78] sm:$0xff]  ;;  %v57_v18 = vld [vmem:[#allocation5 + $0x70] sm:$0xff]  ;;  %v56_v19 = vld [vmem:[#allocation5 + $0x68] sm:$0xff] }
  0x21   :  { %86 = vmatprep.subr.mxu0 %v70_v4  ;;  %v55_v20 = vld [vmem:[#allocation5 + $0x60] sm:$0xff]  ;;  %v54_v21 = vld [vmem:[#allocation5 + $0x58] sm:$0xff]  ;;  %v53_v22 = vld [vmem:[#allocation5 + $0x50] sm:$0xff]  ;;  %p223_p0 = pnand %p222_p13, %p216_p10 }
  0x22   :  { %v52_v23 = vld [vmem:[#allocation5 + $0x48] sm:$0xff]  ;;  %v51_v24 = vld [vmem:[#allocation5 + $0x40] sm:$0xff]  ;;  %v50_v25 = vld [vmem:[#allocation5 + $0x38] sm:$0xff] }
  0x23   :  { %v49_v26 = vld [vmem:[#allocation5 + $0x30] sm:$0xff]  ;;  %v48_v27 = vld [vmem:[#allocation5 + $0x28] sm:$0xff]  ;;  %v47_v28 = vld [vmem:[#allocation5 + $0x20] sm:$0xff] }
  0x24   :  { %87 = vmatpush1.xpose.msra.mxu0 %v69_v5  ;;  %v46_v29 = vld [vmem:[#allocation5 + $0x18] sm:$0xff]  ;;  %v45_v30 = vld [vmem:[#allocation5 + $0x10] sm:$0xff]  ;;  %v44_v31 = vld [vmem:[#allocation5 + $0x8] sm:$0xff] }
  0x25   :  { %88 = vmatprep.subr.mxu0 %v68_v6  ;;  %v43_v32 = vld [vmem:[#allocation5] sm:$0xff]  ;;  %v41_v33 = vld [vmem:[#allocation2] sm:$0xff] }
  0x26   :  { %v169_v34 = vld [vmem:[%s280_s2] ss:$0 sm:$0xff] }
  0x28   :  { %89 = vmatpush1.xpose.msra.mxu0 %v67_v8 }
  0x29   :  { %90 = vmatprep.subr.mxu0 %v66_v9 }
  0x2c   :  { %91 = vmatpush1.xpose.msra.mxu0 %v65_v10 }
  0x2d   :  { %92 = vmatprep.subr.mxu0 %v64_v11 }
  0x30   :  { %93 = vmatpush1.xpose.msra.mxu0 %v63_v12 }
  0x31   :  { %94 = vmatprep.subr.mxu0 %v62_v13 }
  0x34   :  { %95 = vmatpush1.xpose.msra.mxu0 %v61_v14 }
  0x35   :  { %96 = vmatprep.subr.mxu0 %v60_v15 }
  0x38   :  { %97 = vmatpush1.xpose.msra.mxu0 %v59_v16 }
  0x39   :  { %98 = vmatprep.subr.mxu0 %v58_v17 }
  0x3c   :  { %99 = vmatpush1.xpose.msra.mxu0 %v57_v18 }
  0x3d   :  { %100 = vmatprep.subr.mxu0 %v56_v19 }
  0x40   :  { %101 = vmatpush1.xpose.msra.mxu0 %v55_v20 }
  0x41   :  { %102 = vmatprep.subr.mxu0 %v54_v21 }
  0x44   :  { %103 = vmatpush1.xpose.msra.mxu0 %v53_v22 }
  0x45   :  { %104 = vmatprep.subr.mxu0 %v52_v23 }
  0x48   :  { %105 = vmatpush1.xpose.msra.mxu0 %v51_v24 }
  0x49   :  { %106 = vmatprep.subr.mxu0 %v50_v25 }
  0x4c   :  { %107 = vmatpush1.xpose.msra.mxu0 %v49_v26 }
  0x4d   :  { %108 = vmatprep.subr.mxu0 %v48_v27 }
  0x50   :  { %109 = vmatpush1.xpose.msra.mxu0 %v47_v28 }
  0x51   :  { %110 = vmatprep.subr.mxu0 %v46_v29 }
  0x54   :  { %111 = vmatpush1.xpose.msra.mxu0 %v45_v30 }
  0x55   :  { %112 = vmatprep.subr.mxu0 %v44_v31 }
  0x58   :  { %113 = vmatpush1.xpose.msra.mxu0 %v43_v32 }
  0x5b   :  { %147 = vmatmul.mubr.f32.vlgmr.msra.gmra.mxu0 %v41_v33 }
 0x11b   :  { %v148_v35 = vpop.f32.mrf.mxu0 }
 0x11c   :  { %v149_v36 = vadd.f32 %v169_v34, %v148_v35 }
 0x11d   :  { %v150_v37 = vpop.f32.mrf.mxu0 }
 0x11e   :  { %152 = vst [vmem:[#allocation7] sm:$0xff] %v149_v36 }
 0x11f   :  { %226 = shalt.err (!%p223_p0)
}
 0x120   :  { %162 = dma.vmem_to_hbm [thread:$0]  %s160_s25, 128, %s281_s3, [#allocation4]  }
 0x121   :  { %239 = dma.done.wait [#allocation4], 128  }
 0x122   :  { %240 = vsyncadd [#allocation4], 4294967168 }
 0x123   :  { %166 = vsyncpa [#allocation3], 1 }
 0x124   :  { %167 = vsyncpa [#allocation6], 1 }
 0x125   :  { %168 = vsyncpa [#allocation4], 1 }

</bundles_post_ra>
